<compile_context>
chip_gen: v6e
topology: v6e:2x2x1
jax: 0.10.0
libtpu: 0.0.40
codegen_flags: <defaults>
</compile_context>

<pallas_src>
import jax
import jax.numpy as jnp
from jax.experimental import pallas as pl
from jax.experimental.pallas import tpu as pltpu


# ----------------------------------------------------------------------------
# Pallas kernel: fused (conv_ih + conv_hh) matmul + gates + conv_u + GRU update
# Layout: channels on sublanes, flattened spatial positions on lanes.
# ----------------------------------------------------------------------------
def convgru_kernel(fused_ref, h_ref, wbig_ref, bbig_ref, wu_ref, bu_ref, out_ref):
    Ch = h_ref.shape[0]

    # One MXU pass for conv_ih (im2col) and conv_hh (1x1): (3Ch,Kpad)@(Kpad,tm).
    gates = jnp.dot(wbig_ref[...], fused_ref[...],
                    preferred_element_type=jnp.float32) + bbig_ref[...]

    # Rows 0:2Ch are already x_r+h_r and x_i+h_i -> one wide sigmoid (2Ch x tm).
    rz = jax.nn.sigmoid(gates[0:2 * Ch, :])
    r_t = rz[0:Ch, :]
    z_t = rz[Ch:2 * Ch, :]

    h_prev = h_ref[...]                                   # exact f32 carry

    # conv_u(r_t * hidden): 1x1 conv == matmul, bf16 operands, f32 accumulate.
    rh = (r_t * h_prev).astype(wu_ref.dtype)
    u = jnp.dot(wu_ref[...], rh,
                preferred_element_type=jnp.float32) + bu_ref[...]

    h_tilde = jnp.tanh(gates[2 * Ch:3 * Ch, :] + u)

    # hy = (1-z)*h + z*h_tilde  ==  h + z*(h_tilde - h)   (one fewer multiply)
    out_ref[...] = (h_prev + z_t * (h_tilde - h_prev)).astype(out_ref.dtype)


# ----------------------------------------------------------------------------
# Wrapper: NCHW glue + pallas_call
# ----------------------------------------------------------------------------
def convgru_forward_pallas(x_nchw, h_nchw, params, *, kernel_size=3, padding=1,
                           tm=256, mxu_dtype=jnp.bfloat16):
    B, Cin, Hs, Ws = x_nchw.shape
    _, Ch, _, _ = h_nchw.shape
    kh = kw = kernel_size
    assert Ch % 8 == 0, "hidden channels must be sublane-aligned (multiple of 8)"

    w_ih, b_ih, w_hh, b_hh, w_u, b_u = params  # PyTorch OIHW weights

    P = B * Hs * Ws
    K9 = kh * kw * Cin
    Kf = K9 + Ch
    Kpad = ((Kf + 7) // 8) * 8          # pad fused contraction dim to 8 sublanes

    # --- im2col, transposed layout: rows = (dy, dx, cin), cols = (b, y, x) ---
    x_pad = jnp.pad(x_nchw, ((0, 0), (0, 0),
                             (padding, padding), (padding, padding)))
    taps = [x_pad[:, :, dy:dy + Hs, dx:dx + Ws]
            for dy in range(kh) for dx in range(kw)]          # 9 x (B,Cin,Hs,Ws)
    patches_t = jnp.stack(taps, axis=0)                       # (9,B,Cin,Hs,Ws)
    patches_t = jnp.transpose(patches_t, (0, 2, 1, 3, 4)).reshape(K9, P)

    h_t = jnp.transpose(h_nchw, (1, 0, 2, 3)).reshape(Ch, P)  # (Ch, P)

    fused = jnp.concatenate([patches_t, h_t], axis=0)          # (Kf, P)
    if Kpad > Kf:
        fused = jnp.pad(fused, ((0, Kpad - Kf), (0, 0)))

    # --- pad positions to a multiple of the lane tile ------------------------
    Ppad = ((P + tm - 1) // tm) * tm
    if Ppad > P:
        fused = jnp.pad(fused, ((0, 0), (0, Ppad - P)))
        h_t = jnp.pad(h_t, ((0, 0), (0, Ppad - P)))

    fused = fused.astype(mxu_dtype)              # bf16 MXU operand
    h_t32 = h_t.astype(jnp.float32)              # exact f32 carry for gate math

    # --- fused weight: [W_ih | W_hh (zero-padded rows) | zero cols] ----------
    # W_ih: OIHW -> (out, dy, dx, cin) -> (3Ch, K9), matching the patch row order.
    w_ih_mat = jnp.transpose(w_ih, (0, 2, 3, 1)).reshape(3 * Ch, K9)
    w_hh_mat = w_hh.reshape(2 * Ch, Ch)                         # 1x1 conv
    w_hh_pad = jnp.concatenate(
        [w_hh_mat, jnp.zeros((Ch, Ch), w_hh_mat.dtype)], axis=0)  # (3Ch, Ch)
    w_big = jnp.concatenate(
        [w_ih_mat, w_hh_pad,
         jnp.zeros((3 * Ch, Kpad - Kf), w_ih_mat.dtype)], axis=1)  # (3Ch, Kpad)
    w_big = w_big.astype(mxu_dtype)

    # Biases stay f32 (exact) and are added after the f32 MXU accumulation.
    b_big = (b_ih + jnp.concatenate([b_hh, jnp.zeros((Ch,), b_hh.dtype)])
             ).reshape(3 * Ch, 1).astype(jnp.float32)

    w_u_mat = w_u.reshape(Ch, Ch).astype(mxu_dtype)
    b_u_col = b_u.reshape(Ch, 1).astype(jnp.float32)

    grid = (Ppad // tm,)

    out_t = pl.pallas_call(
        convgru_kernel,
        out_shape=jax.ShapeDtypeStruct((Ch, Ppad), jnp.float32),
        grid_spec=pltpu.PrefetchScalarGridSpec(
            num_scalar_prefetch=0,
            grid=grid,
            in_specs=[
                pl.BlockSpec((Kpad, tm), lambda i: (0, i)),      # fused inputs
                pl.BlockSpec((Ch, tm), lambda i: (0, i)),        # hidden (f32)
                pl.BlockSpec((3 * Ch, Kpad), lambda i: (0, 0)),  # W_big (resident)
                pl.BlockSpec((3 * Ch, 1), lambda i: (0, 0)),     # b_big
                pl.BlockSpec((Ch, Ch), lambda i: (0, 0)),        # W_u  (resident)
                pl.BlockSpec((Ch, 1), lambda i: (0, 0)),         # b_u
            ],
            out_specs=pl.BlockSpec((Ch, tm), lambda i: (0, i)),  # lane-dense out
        ),
        compiler_params=pltpu.CompilerParams(
            dimension_semantics=("parallel",)),
    )(fused, h_t32, w_big, b_big, w_u_mat, b_u_col)

    # (Ch, P) -> NCHW
    hy = out_t[:, :P].reshape(Ch, B, Hs, Ws)
    return jnp.transpose(hy, (1, 0, 2, 3))


# ----------------------------------------------------------------------------
# Pure-JAX reference (mirrors the PyTorch forward).  mxu_dtype=None -> exact
# f32; mxu_dtype=bf16 -> quantizes the conv/matmul operands exactly like the
# kernel (f32 accumulation, f32 gate/carry math) for a tight comparison.
# ----------------------------------------------------------------------------
def _conv2d_nchw(x, w, b, padding):
    out = jax.lax.conv_general_dilated(
        x, w, window_strides=(1, 1),
        padding=[(padding, padding), (padding, padding)],
        dimension_numbers=("NCHW", "OIHW", "NCHW"),
        preferred_element_type=jnp.float32)
    return out + b[None, :, None, None]


def convgru_forward_ref(x, h, params, *, padding=1, mxu_dtype=None):
    w_ih, b_ih, w_hh, b_hh, w_u, b_u = params
    q = (lambda a: a.astype(mxu_dtype)) if mxu_dtype is not None else (lambda a: a)
    gate_x = _conv2d_nchw(q(x), q(w_ih), b_ih, padding)
    gate_h = _conv2d_nchw(q(h), q(w_hh), b_hh, 0)
    x_r, x_i, x_u = jnp.split(gate_x, 3, axis=1)
    h_r, h_i = jnp.split(gate_h, 2, axis=1)
    r_t = jax.nn.sigmoid(x_r + h_r)
    z_t = jax.nn.sigmoid(x_i + h_i)
    h_tilde = jnp.tanh(x_u + _conv2d_nchw(q(r_t * h), q(w_u), b_u, 0))
    return (1.0 - z_t) * h + z_t * h_tilde


# ----------------------------------------------------------------------------
def init_params(key, input_channels, hidden_channels, kernel_size):
    # deterministic synthetic init (uniform ~ PyTorch Conv2d default range)
    ks = jax.random.split(key, 6)

    def uconv(k, cout, cin, khh, kww):
        bound = 1.0 / jnp.sqrt(cin * khh * kww)
        return jax.random.uniform(k, (cout, cin, khh, kww), jnp.float32,
                                  -bound, bound)

    def ubias(k, cout, cin, khh, kww):
        bound = 1.0 / jnp.sqrt(cin * khh * kww)
        return jax.random.uniform(k, (cout,), jnp.float32, -bound, bound)

    Ci, Ch, K = input_channels, hidden_channels, kernel_size
    w_ih = uconv(ks[0], 3 * Ch, Ci, K, K)
    b_ih = ubias(ks[1], 3 * Ch, Ci, K, K)
    w_hh = uconv(ks[2], 2 * Ch, Ch, 1, 1)
    b_hh = ubias(ks[3], 2 * Ch, Ch, 1, 1)
    w_u = uconv(ks[4], Ch, Ch, 1, 1)
    b_u = ubias(ks[5], Ch, Ch, 1, 1)
    return (w_ih, b_ih, w_hh, b_hh, w_u, b_u)


if __name__ == "__main__":
    B, Cin, Ch, S = 2, 4, 32, 16
    key = jax.random.PRNGKey(0)
    kx, kh_, kp = jax.random.split(key, 3)

    x = jax.random.normal(kx, (B, Cin, S, S), jnp.float32)       # input  NCHW
    h = jax.random.normal(kh_, (B, Ch, S, S), jnp.float32)       # hidden NCHW
    params = init_params(kp, Cin, Ch, kernel_size=3)

    hy = convgru_forward_pallas(x, h, params, kernel_size=3, padding=1, tm=256)
    hy = jax.block_until_ready(hy)
    assert hy.shape == (B, Ch, S, S), hy.shape
    assert bool(jnp.all(jnp.isfinite(hy)))

    # Tight check against a reference with the SAME bf16 MXU-operand
    # quantization (f32 accumulation) -> only accumulation-order noise remains.
    hy_q = jax.block_until_ready(
        convgru_forward_ref(x, h, params, padding=1, mxu_dtype=jnp.bfloat16))
    err_q = float(jnp.max(jnp.abs(hy - hy_q)))
    assert err_q < 2e-2, f"quantized-ref mismatch: {err_q}"

    # Loose guard against the exact f32 reference (bf16 quantization noise only).
    hy_f = jax.block_until_ready(convgru_forward_ref(x, h, params, padding=1))
    err_f = float(jnp.max(jnp.abs(hy - hy_f)))
    assert err_f < 1.5e-1, f"f32-ref mismatch: {err_f}"

    print("KERNEL_OK")
</pallas_src>

<mosaic_0001>
module attributes {stable_mosaic.version = 11 : i64} {
  func.func @convgru_kernel(%arg0: i32, %arg1: memref<72x256xbf16, #tpu.memory_space<vmem>>, %arg2: memref<32x256xf32, #tpu.memory_space<vmem>>, %arg3: memref<96x72xbf16, #tpu.memory_space<vmem>>, %arg4: memref<96x1xf32, #tpu.memory_space<vmem>>, %arg5: memref<32x32xbf16, #tpu.memory_space<vmem>>, %arg6: memref<32x1xf32, #tpu.memory_space<vmem>>, %arg7: memref<32x256xf32, #tpu.memory_space<vmem>>) attributes {dimension_semantics = [#tpu.dimension_semantics<parallel>], iteration_bounds = array<i64: 2>, scalar_prefetch = 0 : i64, scratch_operands = 0 : i64, tpu.core_type = #tpu.core_type<tc>, window_params = [{transform_indices = @transform_0, window_bounds = array<i64: 72, 256>}, {transform_indices = @transform_1, window_bounds = array<i64: 32, 256>}, {pipeline_mode = #tpu.pipeline_mode<synchronous>, transform_indices = @transform_2, window_bounds = array<i64: 96, 72>}, {pipeline_mode = #tpu.pipeline_mode<synchronous>, transform_indices = @transform_3, window_bounds = array<i64: 96, 1>}, {pipeline_mode = #tpu.pipeline_mode<synchronous>, transform_indices = @transform_4, window_bounds = array<i64: 32, 32>}, {pipeline_mode = #tpu.pipeline_mode<synchronous>, transform_indices = @transform_5, window_bounds = array<i64: 32, 1>}, {transform_indices = @transform_6, window_bounds = array<i64: 32, 256>}]} {
    %c0 = arith.constant 0 : index
    %c0_0 = arith.constant 0 : index
    %0 = vector.load %arg3[%c0, %c0_0] : memref<96x72xbf16, #tpu.memory_space<vmem>>, vector<96x72xbf16>
    %c0_1 = arith.constant 0 : index
    %c0_2 = arith.constant 0 : index
    %1 = vector.load %arg1[%c0_1, %c0_2] : memref<72x256xbf16, #tpu.memory_space<vmem>>, vector<72x256xbf16>
    %cst = arith.constant dense<0.000000e+00> : vector<96x256xf32>
    %2 = tpu.matmul %0, %1, %cst {dimension_numbers = #tpu.dot_dimension_numbers<[1], [0], [0], [1], [0, 0, 1, 1], [], []>} : vector<96x72xbf16>, vector<72x256xbf16>, vector<96x256xf32> -> vector<96x256xf32>
    %c0_3 = arith.constant 0 : index
    %c0_4 = arith.constant 0 : index
    %3 = vector.load %arg4[%c0_3, %c0_4] : memref<96x1xf32, #tpu.memory_space<vmem>>, vector<96x1xf32>
    %4 = vector.broadcast %3 : vector<96x1xf32> to vector<96x256xf32>
    %5 = arith.addf %2, %4 : vector<96x256xf32>
    %6 = vector.extract_strided_slice %5 {offsets = [0, 0], sizes = [64, 256], strides = [1, 1]} : vector<96x256xf32> to vector<64x256xf32>
    %7 = arith.negf %6 : vector<64x256xf32>
    %8 = math.exp %7 : vector<64x256xf32>
    %cst_5 = arith.constant 1.000000e+00 : f32
    %9 = vector.broadcast %cst_5 : f32 to vector<64x256xf32>
    %10 = arith.addf %9, %8 : vector<64x256xf32>
    %11 = arith.divf %9, %10 : vector<64x256xf32>
    %12 = vector.extract_strided_slice %11 {offsets = [0, 0], sizes = [32, 256], strides = [1, 1]} : vector<64x256xf32> to vector<32x256xf32>
    %13 = vector.extract_strided_slice %11 {offsets = [32, 0], sizes = [32, 256], strides = [1, 1]} : vector<64x256xf32> to vector<32x256xf32>
    %c0_6 = arith.constant 0 : index
    %c0_7 = arith.constant 0 : index
    %14 = vector.load %arg2[%c0_6, %c0_7] : memref<32x256xf32, #tpu.memory_space<vmem>>, vector<32x256xf32>
    %15 = arith.mulf %12, %14 : vector<32x256xf32>
    %16 = arith.truncf %15 : vector<32x256xf32> to vector<32x256xbf16>
    %c0_8 = arith.constant 0 : index
    %c0_9 = arith.constant 0 : index
    %17 = vector.load %arg5[%c0_8, %c0_9] : memref<32x32xbf16, #tpu.memory_space<vmem>>, vector<32x32xbf16>
    %cst_10 = arith.constant dense<0.000000e+00> : vector<32x256xf32>
    %18 = tpu.matmul %17, %16, %cst_10 {dimension_numbers = #tpu.dot_dimension_numbers<[1], [0], [0], [1], [0, 0, 1, 1], [], []>} : vector<32x32xbf16>, vector<32x256xbf16>, vector<32x256xf32> -> vector<32x256xf32>
    %c0_11 = arith.constant 0 : index
    %c0_12 = arith.constant 0 : index
    %19 = vector.load %arg6[%c0_11, %c0_12] : memref<32x1xf32, #tpu.memory_space<vmem>>, vector<32x1xf32>
    %20 = vector.broadcast %19 : vector<32x1xf32> to vector<32x256xf32>
    %21 = arith.addf %18, %20 : vector<32x256xf32>
    %22 = vector.extract_strided_slice %5 {offsets = [64, 0], sizes = [32, 256], strides = [1, 1]} : vector<96x256xf32> to vector<32x256xf32>
    %23 = arith.addf %22, %21 : vector<32x256xf32>
    %24 = math.tanh %23 : vector<32x256xf32>
    %25 = arith.subf %24, %14 : vector<32x256xf32>
    %26 = arith.mulf %13, %25 : vector<32x256xf32>
    %27 = arith.addf %14, %26 : vector<32x256xf32>
    %c0_13 = arith.constant 0 : index
    %c0_14 = arith.constant 0 : index
    %28 = vector.load %arg7[%c0_13, %c0_14] : memref<32x256xf32, #tpu.memory_space<vmem>>, vector<32x256xf32>
    tpu.vector_store %arg7[%c0_13, %c0_14], %27 {strides = array<i32>} : memref<32x256xf32, #tpu.memory_space<vmem>>, vector<32x256xf32>,
    return
  }
  func.func @transform_0(%arg0: i32) -> (i32, i32) {
    %c0_i32 = arith.constant 0 : i32
    %c0_i32_0 = arith.constant 0 : i32
    return %c0_i32, %arg0 : i32, i32
  }
  func.func @transform_1(%arg0: i32) -> (i32, i32) {
    %c0_i32 = arith.constant 0 : i32
    %c0_i32_0 = arith.constant 0 : i32
    return %c0_i32, %arg0 : i32, i32
  }
  func.func @transform_2(%arg0: i32) -> (i32, i32) {
    %c0_i32 = arith.constant 0 : i32
    %c0_i32_0 = arith.constant 0 : i32
    %c0_i32_1 = arith.constant 0 : i32
    return %c0_i32, %c0_i32_0 : i32, i32
  }
  func.func @transform_3(%arg0: i32) -> (i32, i32) {
    %c0_i32 = arith.constant 0 : i32
    %c0_i32_0 = arith.constant 0 : i32
    %c0_i32_1 = arith.constant 0 : i32
    return %c0_i32, %c0_i32_0 : i32, i32
  }
  func.func @transform_4(%arg0: i32) -> (i32, i32) {
    %c0_i32 = arith.constant 0 : i32
    %c0_i32_0 = arith.constant 0 : i32
    %c0_i32_1 = arith.constant 0 : i32
    return %c0_i32, %c0_i32_0 : i32, i32
  }
  func.func @transform_5(%arg0: i32) -> (i32, i32) {
    %c0_i32 = arith.constant 0 : i32
    %c0_i32_0 = arith.constant 0 : i32
    %c0_i32_1 = arith.constant 0 : i32
    return %c0_i32, %c0_i32_0 : i32, i32
  }
  func.func @transform_6(%arg0: i32) -> (i32, i32) {
    %c0_i32 = arith.constant 0 : i32
    %c0_i32_0 = arith.constant 0 : i32
    return %c0_i32, %arg0 : i32, i32
  }
}

</mosaic_0001>

<bundles_post_ra>
// kernel: tpu_custom_call.1
= control target key start
LH: loop header
LB: loop body
LE: loop exit
PB: predicated region body
PF: predicated region fallthrough
CT: control target
= control target key end

     0   :  { %11 = vsyncpa [#allocation4], 0  ;;  %s1701_s0 = inlined_call_operand.vmem [shape: bf16[72,512], index: 0, kind: input, shape index: {}]   ;;  %s1702_s1 = inlined_call_operand.hbm [shape: f32[32,512], index: 1, kind: input, shape index: {}]   ;;  %s1703_s2 = inlined_call_operand.vmem [shape: bf16[96,72], index: 2, kind: input, shape index: {}]   ;;  %s1704_s3 = inlined_call_operand.vmem [shape: f32[96,1], index: 3, kind: input, shape index: {}]   ;;  %s1705_s4 = inlined_call_operand.vmem [shape: bf16[32,32], index: 4, kind: input, shape index: {}]   ;;  %s1706_s5 = inlined_call_operand.vmem [shape: f32[32,1], index: 5, kind: input, shape index: {}]   ;;  %s1707_s6 = inlined_call_operand.hbm [shape: f32[32,512], index: 6, kind: output, shape index: {}]  }
   0x1   :  { %13 = vsyncpa [#allocation4 + $0x1], 0 }
   0x2   :  { %14 = vsyncpa [#allocation5], 0 }
   0x3   :  { %16 = vsyncpa [#allocation5 + $0x1], 0  ;;  %s1378_s21 = smov 0   ;;  %s1380_s22 = smov 0  }
   0x4   :  { %s1382_s23 = smov 0   ;;  %s1384_s24 = smov 0  }
   0x5 LB: > { %s1399_s25 = sadd.s32 4294967295, %s1332_s24   ;;  %s1016_s26 = sadd.s32 4294967294, %s1332_s24   ;;  %s1332_s24 = sphi %s1384_s24, %s1720_s24   ;;  %s1328_s23 = sphi %s1382_s23, %s1719_s23   ;;  %s1324_s22 = sphi %s1380_s22, %s1718_s22   ;;  %s1320_s21 = sphi %s1378_s21, %s1717_s21  }
   0x6   : > { %s1403_s27 = sadd.s32 1, %s1332_s24   ;;  %s29_s28 = sadd.s32 1, %s1328_s23 }
   0x7   : > { %s26_s29 = ssub.s32 %s1332_s24, %s1403_s27  ;;  %p36_p0 = scmp.ne.s32.totalorder %s1328_s23, %s1324_s22 }
   0x8   : > { %p27_p1 = scmp.eq.s32.totalorder %s26_s29, 0  ;;  %p37_p2 = scmp.eq.s32.totalorder %s1332_s24, 0 }
   0x9   : > { %p68_p3 = scmp.ne.s32.totalorder %s1324_s22, %s1320_s21  ;;  %p69_p4 = scmp.eq.s32.totalorder %s1399_s25, 0 }
   0xa   : > { %s1415_s30 = scalar_select %p27_p1, %s1328_s23, %s29_s28  }
   0xb   : > { %p1417_p5 = por %p37_p2, %p36_p0  ;;  %p1421_p6 = por %p69_p4, %p68_p3 }
   0xc   : > { %p176_p7 = scmp.eq.s32.totalorder %s1399_s25, 1  ;;  %p182_p8 = scmp.eq.s32.totalorder %s1016_s26, 1 }
   0xd   : > { %p1708_p11 = scmp.ge.s32.totalorder %s1332_s24, 2 }
   0xe   : > { %p1426_p9 = por %p176_p7, %p36_p0  ;;  %p1430_p10 = por %p182_p8, %p68_p3 }
   0xf   : > { %210 = sbr.rel (%p1708_p11) target bundleno = 55 (0x37), region = 32 }
  0x10   : > { %s1712_s9 = scalar_select %p1426_p9, 1, 0 }
  0x11   : > { %s1713_s10 = scalar_select %p1430_p10, 1, 0 }
  0x14   : > { %213 = sbr.rel (!%p1417_p5) target bundleno = 29 (0x1d), region = 36  ;;  %s215_s11 = sand.u32 (%p1417_p5), 1, %s1328_s23  }
  0x15   : > { %s1075_s12 = sshll.u32 (%p1417_p5), %s1332_s24, 3  ;;  %s1088_s13 = smul.u32 (%p1417_p5), 72, %s215_s11 }
  0x16   : > { %s220_s16 = scalar_lea.vmem (%p1417_p5), %s1701_s0, %s1075_s12 }
  0x17   : > { %v265_v0 = vld [vmem:[%s220_s16] sm:$0xff] (%p1417_p5)  ;;  %v267_v1 = vld [vmem:[%s220_s16 + $0x10] sm:$0xff] (%p1417_p5)  ;;  %s217_s17 = scalar_lea.vmem (%p1417_p5), [#allocation2], %s1088_s13 }
  0x18   : > { %v269_v2 = vld [vmem:[%s220_s16 + $0x20] sm:$0xff] (%p1417_p5)  ;;  %v271_v3 = vld [vmem:[%s220_s16 + $0x30] sm:$0xff] (%p1417_p5)  ;;  %266 = vst [vmem:[%s217_s17] sm:$0xff] (%p1417_p5), %v265_v0  ;;  %268 = vst [vmem:[%s217_s17 + $0x8] sm:$0xff] (%p1417_p5), %v267_v1 }
  0x19   : > { %v273_v4 = vld [vmem:[%s220_s16 + $0x40] sm:$0xff]  ;;  %v275_v5 = vld [vmem:[%s220_s16 + $0x50] sm:$0xff]  ;;  %270 = vst [vmem:[%s217_s17 + $0x10] sm:$0xff] %v269_v2  ;;  %272 = vst [vmem:[%s217_s17 + $0x18] sm:$0xff] %v271_v3 }
  0x1a   : > { %274 = vst [vmem:[%s217_s17 + $0x20] sm:$0xff] %v273_v4  ;;  %276 = vst [vmem:[%s217_s17 + $0x28] sm:$0xff] %v275_v5  ;;  %v277_v6 = vld [vmem:[%s220_s16 + $0x60] sm:$0xff]  ;;  %v279_v7 = vld [vmem:[%s220_s16 + $0x70] sm:$0xff] }
  0x1b   : > { %v281_v8 = vld [vmem:[%s220_s16 + $0x80] sm:$0xff]  ;;  %278 = vst [vmem:[%s217_s17 + $0x30] sm:$0xff] %v277_v6  ;;  %280 = vst [vmem:[%s217_s17 + $0x38] sm:$0xff] %v279_v7 }
  0x1c   : > { %282 = vst [vmem:[%s217_s17 + $0x40] sm:$0xff] %v281_v8 }
  0x1d PF: > { %s289_s18 = sand.u32 1, %s1328_s23   ;;  %s1076_s19 = sshll.u32 %s1332_s24, 8 }
  0x1e   : > { %s1021_s20 = sshll.u32 %s289_s18, 6  ;;  %s1449_s29 = scalar_lea.hbm %s1702_s1, %s1076_s19 }
  0x1f   : > { %s293_s11 = scalar_lea.vmem [#allocation3], %s1021_s20  ;;  %s1453_s13 = scalar_lea.sflag [#allocation4], %s289_s18 }
  0x20   : > { %s300_s12 = sshll.u32 %s293_s11, 4  ;;  %s1242_s14 = scalar_lea.hbm %s1449_s29, 1024  ;;  %s1451_s12 = int_to_ptr.vmem [resolvable:$true] %s300_s12 }
  0x21   : > { %p1243_p12 = scmp.ne.s32.totalorder %s1449_s29, %s1242_s14  ;;  %s1246_s17 = scalar_lea.hbm %s1702_s1, 2048 }
  0x22   : > { %p1247_p1 = scmp.lt.s32.totalorder %s1449_s29, %s1702_s1  ;;  %p1248_p2 = scmp.lt.s32.totalorder %s1246_s17, %s1242_s14 }
  0x23   : > { %p1244_p13 = pnand %p1243_p12, %p1417_p5 }
  0x24   : > { %p1249_p3 = por %p1248_p2, %p1247_p1 }
  0x25   : > { %p1245_p0 = pneg %p1244_p13 }
  0x27   : > { %p1250_p4 = pnand %p1249_p3, %p1245_p0 }
  0x29   : > { %1253 = shalt.err (!%p1250_p4)
}
  0x2a   : > { %s1254_s18 = scalar_lea.vmem %s1451_s12, 1024  ;;  %s1334_s20 = smov [#allocation3]  }
  0x2b   : > { %p1255_p7 = scmp.ne.s32.totalorder %s1451_s12, %s1254_s18  ;;  %s1258_s28 = sshll.u32 %s1334_s20, 4  ;;  %s1259_s28 = int_to_ptr.vmem [resolvable:$false] %s1258_s28 }
  0x2c   : > { %s1260_s11 = scalar_lea.vmem %s1259_s28, 2048  ;;  %p1261_p13 = scmp.lt.s32.totalorder %s1451_s12, %s1259_s28 }
  0x2d   : > { %p1256_p8 = pnand %p1255_p7, %p1417_p5  ;;  %p1262_p11 = scmp.lt.s32.totalorder %s1260_s11, %s1254_s18 }
  0x2f   : > { %p1257_p12 = pneg %p1256_p8  ;;  %p1263_p10 = por %p1262_p11, %p1261_p13 }
  0x31   : > { %p1264_p9 = pnand %p1263_p10, %p1257_p12 }
  0x33   : > { %1267 = shalt.err (!%p1264_p9)
}
  0x34   : > { %s1335_s14 = smov 512   ;;  %s1336_s15 = smov 256  }
  0x35   : > { %s1337_s16 = smov 16  }
  0x36   : > { %1090 = dma.hbm_to_vmem [thread:$0]  (%p1417_p5), %s1449_s29, 1024, %s1451_s12, %s1453_s13, %s1335_s14, %s1336_s15, %s1337_s16  }
  0x37 PF: > { %p1024_p0 = scmp.ge.s32.totalorder %s1332_s24, 1  ;;  %p308_p1 = scmp.lt.s32.totalorder %s1332_s24, 3 }
  0x39   : > { %p309_p2 = pnand %p1024_p0, %p308_p1 }
  0x3a   : > { %s1479_s17 = sand.u32 (!%p309_p2), 1, %s1324_s22  }
  0x3b   : > { %312 = sbr.rel (%p309_p2) target bundleno = 587 (0x24b), region = 78  ;;  %s1025_s26 = sshll.u32 (!%p309_p2), %s1479_s17, 6 }
  0x3c   : > { %s1089_s19 = smul.u32 (!%p309_p2), 72, %s1479_s17  ;;  %s322_s7 = scalar_lea.sflag (!%p309_p2), [#allocation4], %s1479_s17 }
  0x3d   : > { %s1488_s29 = scalar_lea.vmem (!%p309_p2), [#allocation3], %s1025_s26 }
  0x3e   : > { %s1483_s18 = scalar_lea.vmem (!%p309_p2), [#allocation2], %s1089_s19 }
  0x40   : > { %1311 = dma.done.wait (%p1421_p6), %s322_s7, 1024  }
  0x41   : > { %1313 = vsyncadd (%p1421_p6), %s322_s7, 4294966272  ;;  %v1338_v9 = vmov 0   ;;  %v382_v10 = vld [vmem:[%s1483_s18 + $0x40] sm:$0xff]  ;;  %vm549_vm0 = vcmask 1043456   ;;  %v1142_v13 = vld [vmem:[%s1483_s18 + $0x34] ss:$8 sps:$4 sm:$0xff]  }
  0x42   : > { %588 = vmatprep.mubr.bf16.mxu0 %v1338_v9  ;;  %628 = vmatprep.mubr.bf16.mxu1 %v1338_v9  ;;  %v1042_v11 = vcombine.high %v382_v10, %v382_v10  ;;  %v1041_v12 = vcombine.low %v382_v10, %v382_v10  ;;  %v1144_v15 = vld [vmem:[%s1483_s18 + $0x30] ss:$8 sps:$4 sm:$0xff]   ;;  %v1145_v16 = vld [vmem:[%s1483_s18 + $0x24] ss:$8 sps:$4 sm:$0xff]   ;;  %v1147_v17 = vld [vmem:[%s1483_s18 + $0x20] ss:$8 sps:$4 sm:$0xff]  }
  0x43   : > { %1138 = vset.pattern.permute.xlu0 %v1338_v9  ;;  %1139 = vset.pattern.permute.xlu1 %v1338_v9  ;;  %v1148_v18 = vld [vmem:[%s1483_s18 + $0x14] ss:$8 sps:$4 sm:$0xff]   ;;  %v1150_v20 = vld [vmem:[%s1483_s18 + $0x10] ss:$8 sps:$4 sm:$0xff]   ;;  %v1151_v22 = vld [vmem:[%s1483_s18 + $0x4] ss:$8 sps:$4 sm:$0xff]  }
  0x44   : > { %1043 = vmatprep.subr.msk.bf16.mxu0 %vm549_vm0, %v1042_v11  ;;  %1078 = vmatprep.subr.msk.bf16.mxu1 %vm549_vm0, %v1042_v11  ;;  %v551_v14 = vsel %vm549_vm0, %v1041_v12, 0  ;;  %v385_v19 = vld [vmem:[%s1704_s3 + $0x10] sm:$0xff]  ;;  %v383_v21 = vld [vmem:[%s1704_s3] sm:$0xff]  ;;  %v386_v23 = vld [vmem:[%s1704_s3 + $0x18] sm:$0xff]  ;;  %vm530_vm1 = vcmask 588800   ;;  %vm803_vm2 = vcmask 261120  }
  0x45   : > { %563 = vmatpush1.bf16.msra.mxu0 %v551_v14  ;;  %1083 = vmatpush1.bf16.msra.mxu1 %v551_v14  ;;  %v384_v24 = vld [vmem:[%s1704_s3 + $0x8] sm:$0xff]  ;;  %v1154_v26 = vld [vmem:[%s1703_s2] sm:$0xff]   ;;  %v389_v30 = vld [vmem:[%s1704_s3 + $0x30] sm:$0xff]  ;;  %s1629_s8 = scalar_lea.vmem [#allocation6], %s1025_s26  ;;  %s1077_s26 = sshll.u32 %s1399_s25, 8 }
  0x46   : > { %564 = vmatprep.subr.bf16.mxu0 %v1142_v13  ;;  %1079 = vmatprep.subr.bf16.mxu1 %v1142_v13  ;;  %v1153_v25 = vld [vmem:[%s1483_s18] ss:$8 sps:$4 sm:$0xff]   ;;  %v390_v31 = vld [vmem:[%s1704_s3 + $0x38] sm:$0xff]  ;;  %s925_s12 = sshll.u32 %s1629_s8, 4  ;;  %s1653_s28 = scalar_lea.hbm %s1707_s6, %s1077_s26  ;;  %s1655_s12 = int_to_ptr.vmem [resolvable:$true] %s925_s12 }
  0x47   : > { %407 = vperm.xlu0 %1138, %v385_v19   ;;  %397 = vperm.xlu1 %1139, %v383_v21   ;;  %v1155_v27 = vld [vmem:[%s1703_s2 + $0x20] sm:$0xff]   ;;  %v388_v29 = vld [vmem:[%s1704_s3 + $0x28] sm:$0xff]  ;;  %v393_v36 = vld [vmem:[%s1704_s3 + $0x50] sm:$0xff]  ;;  %s912_s25 = scalar_lea.sflag [#allocation5], %s1479_s17  ;;  %s1268_s18 = scalar_lea.vmem %s1655_s12, 1024 }
  0x48   : > { %v387_v28 = vld [vmem:[%s1704_s3 + $0x20] sm:$0xff]  ;;  %v1156_v32 = vld [vmem:[%s1703_s2 + $0x8] sm:$0xff]   ;;  %v394_v37 = vld [vmem:[%s1704_s3 + $0x58] sm:$0xff]  ;;  %p1269_p5 = scmp.ne.s32.totalorder %s1655_s12, %s1268_s18  ;;  %p1714_p6 = scmp.ne.s32.totalorder %s1712_s9, 0 }
  0x49   : > { %565 = vmatpush1.bf16.msra.mxu0 %v1144_v15  ;;  %1084 = vmatpush1.bf16.msra.mxu1 %v1144_v15  ;;  %v1157_v33 = vld [vmem:[%s1703_s2 + $0x28] sm:$0xff]   ;;  %v391_v34 = vld [vmem:[%s1704_s3 + $0x40] sm:$0xff]  ;;  %v1158_v38 = vld [vmem:[%s1703_s2 + $0x10] sm:$0xff]   ;;  %s1339_s11 = smov [#allocation6]  }
  0x4a   : > { %566 = vmatprep.subr.bf16.mxu0 %v1145_v16  ;;  %1080 = vmatprep.subr.bf16.mxu1 %v1145_v16  ;;  %v392_v35 = vld [vmem:[%s1704_s3 + $0x48] sm:$0xff]  ;;  %v769_v39 = vld [vmem:[%s1706_s5] sm:$0xff]  ;;  %v771_v41 = vld [vmem:[%s1706_s5 + $0x10] sm:$0xff]  ;;  %p1270_p9 = pnand %p1269_p5, %p1714_p6  ;;  %s1272_s14 = sshll.u32 %s1339_s11, 4  ;;  %s1273_s14 = int_to_ptr.vmem [resolvable:$false] %s1272_s14 }
  0x4b   : > { %412 = vperm.xlu0 %1138, %v386_v23   ;;  %402 = vperm.xlu1 %1139, %v384_v24   ;;  %v770_v40 = vld [vmem:[%s1706_s5 + $0x8] sm:$0xff]  ;;  %v772_v42 = vld [vmem:[%s1706_s5 + $0x18] sm:$0xff]  ;;  %s1274_s15 = scalar_lea.vmem %s1273_s14, 2048  ;;  %p1275_p11 = scmp.lt.s32.totalorder %s1655_s12, %s1273_s14 }
  0x4c   : > { %v1159_v43 = vld [vmem:[%s1703_s2 + $0x18] sm:$0xff]   ;;  %p1271_p10 = pneg %p1270_p9  ;;  %p1276_p3 = scmp.lt.s32.totalorder %s1274_s15, %s1268_s18 }
  0x4d   : > { %567 = vmatpush1.bf16.msra.mxu0 %v1147_v17  ;;  %1085 = vmatpush1.bf16.msra.mxu1 %v1147_v17 }
  0x4e   : > { %568 = vmatprep.subr.bf16.mxu0 %v1148_v18  ;;  %1081 = vmatprep.subr.bf16.mxu1 %v1148_v18  ;;  %p1277_p4 = por %p1276_p3, %p1275_p11 }
  0x4f   : > { %417 = vperm.xlu0 %1138, %v387_v28   ;;  %422 = vperm.xlu1 %1139, %v388_v29   ;;  %v1585_v28 = vld [vmem:[%s1488_s29 + $0x30] sm:$0xff] }
  0x50   : > { %p1278_p7 = pnand %p1277_p4, %p1271_p10 }
  0x51   : > { %569 = vmatpush1.bf16.msra.mxu0 %v1150_v20  ;;  %1086 = vmatpush1.bf16.msra.mxu1 %v1150_v20 }
  0x52   : > { %570 = vmatprep.subr.bf16.mxu0 %v1151_v22  ;;  %1082 = vmatprep.subr.bf16.mxu1 %v1151_v22 }
  0x53   : > { %427 = vperm.xlu0 %1138, %v389_v30   ;;  %432 = vperm.xlu1 %1139, %v390_v31   ;;  %v1588_v30 = vld [vmem:[%s1488_s29 + $0x28] sm:$0xff]  ;;  %v1591_v31 = vld [vmem:[%s1488_s29 + $0x38] sm:$0xff] }
  0x55   : > { %571 = vmatpush1.bf16.msra.mxu0 %v1153_v25  ;;  %1087 = vmatpush1.bf16.msra.mxu1 %v1153_v25 }
  0x57   : > { %437 = vperm.xlu0 %1138, %v391_v34   ;;  %442 = vperm.xlu1 %1139, %v392_v35   ;;  %v1597_v34 = vld [vmem:[%s1488_s29 + $0x20] sm:$0xff] }
  0x58   : > { %1044 = vmatmul.mubr.msk.bf16.vlgmr.msra.gmra.mxu0 %vm530_vm1, %v1154_v26  ;;  %1048 = vmatmul.mubr.msk.bf16.vlgmr.msra.gmra.mxu1 %vm530_vm1, %v1155_v27 }
  0x59   : > { %598 = vmatprep.mubr.bf16.mxu0 %v1338_v9  ;;  %638 = vmatprep.mubr.bf16.mxu1 %v1338_v9 }
  0x5b   : > { %447 = vperm.xlu0 %1138, %v393_v36   ;;  %452 = vperm.xlu1 %1139, %v394_v37   ;;  %v1601_v37 = vld [vmem:[%s1488_s29 + $0x8] sm:$0xff] }
  0x5f   : > { %775 = vperm.xlu0 %1138, %v769_v39   ;;  %780 = vperm.xlu1 %1139, %v770_v40  }
  0x60   : > { %1045 = vmatmul.mubr.msk.bf16.gmra.mxu0 %vm530_vm1, %v1156_v32  ;;  %1049 = vmatmul.mubr.msk.bf16.gmra.mxu1 %vm530_vm1, %v1157_v33  ;;  %v1594_v32 = vld [vmem:[%s1488_s29 + $0x18] sm:$0xff] }
  0x61   : > { %608 = vmatprep.mubr.bf16.mxu0 %v1338_v9  ;;  %842 = vmatprep.mubr.bf16.mxu1 %v1338_v9 }
  0x63   : > { %785 = vperm.xlu0 %1138, %v771_v41   ;;  %790 = vperm.xlu1 %1139, %v772_v42   ;;  %v1607_v42 = vld [vmem:[%s1488_s29 + $0x10] sm:$0xff] }
  0x68   : > { %1046 = vmatmul.mubr.msk.bf16.gmra.mxu0 %vm530_vm1, %v1158_v38 }
  0x69   : > { %618 = vmatprep.mubr.bf16.mxu0 %v1338_v9 }
  0x70   : > { %1047 = vmatmul.mubr.msk.bf16.gmra.mxu0 %vm530_vm1, %v1159_v43 }
  0xc2   : > { %v398_v44 = vpop.permute.xlu1 %397  ;;  %v408_v49 = vpop.permute.xlu0 %407 }
  0xc6   : > { %v403_v50 = vpop.permute.xlu1 %402  ;;  %v413_v62 = vpop.permute.xlu0 %412 }
 0x118   : > { %v590_v45 = vpop.f32.mrf.mxu0 }
 0x119   : > { %v591_v58 = vadd.f32 %v590_v45, %v398_v44 }
 0x11a   : > { %v592_v46 = vpop.f32.mrf.mxu0 }
 0x11b   : > { %v593_v47 = vadd.f32 %v592_v46, %v398_v44  ;;  %v1050_v3 = vmul.f32 -1.442695, %v591_v58 }
 0x11c   : > { %v594_v48 = vpop.f32.mrf.mxu0 }
 0x11d   : > { %v1051_v51 = vmul.f32 -1.442695, %v593_v47  ;;  %v595_v54 = vadd.f32 %v594_v48, %v403_v50  ;;  %v1612_v47 = vld [vmem:[%s1488_s29] sm:$0xff] }
 0x11e   : > { %v596_v52 = vpop.f32.mrf.mxu0 }
 0x11f   : > { %v597_v53 = vadd.f32 %v596_v52, %v403_v50  ;;  %1162 = vpow2.f32 %v1051_v51  ;;  %v1052_v63 = vmul.f32 -1.442695, %v595_v54  ;;  %v1161_v54 = vld [vmem:[%s1705_s4 + $0x8] sm:$0xff]  }
 0x120   : > { %v600_v55 = vpop.f32.mrf.mxu0 }
 0x121   : > { %v1053_v56 = vmul.f32 -1.442695, %v597_v53  ;;  %v601_v57 = vadd.f32 %v600_v55, %v408_v49  ;;  %v1160_v53 = vld [vmem:[%s1705_s4] sm:$0xff]  }
 0x122   : > { %v602_v59 = vpop.f32.mrf.mxu0 }
 0x123   : > { %1164 = vpow2.f32 %v1053_v56  ;;  %v1054_v60 = vmul.f32 -1.442695, %v601_v57  ;;  %v603_v61 = vadd.f32 %v602_v59, %v408_v49  ;;  %v630_v57 = vpop.f32.mrf.mxu1 }
 0x124   : > { %v604_v0 = vpop.f32.mrf.mxu0 }
 0x125   : > { %v1055_v1 = vmul.f32 -1.442695, %v603_v61  ;;  %v605_v2 = vadd.f32 %v604_v0, %v413_v62  ;;  %1166 = vpow2.f32 %v1054_v60  ;;  %v632_v59 = vpop.f32.mrf.mxu1  ;;  %v418_v61 = vpop.permute.xlu0 %417 }
 0x126   : > { %v606_v4 = vpop.f32.mrf.mxu0 }
 0x127   : > { %1168 = vpow2.f32 %v1055_v1  ;;  %v1056_v5 = vmul.f32 -1.442695, %v605_v2  ;;  %v607_v6 = vadd.f32 %v606_v4, %v413_v62  ;;  %v634_v62 = vpop.f32.mrf.mxu1  ;;  %v423_v1 = vpop.permute.xlu1 %422 }
 0x128   : > { %1170 = vpow2.f32 %v1052_v63  ;;  %v610_v55 = vpop.f32.mrf.mxu0 }
 0x129   : > { %1172 = vpow2.f32 %v1056_v5  ;;  %v1057_v7 = vmul.f32 -1.442695, %v607_v6  ;;  %v611_v63 = vadd.f32 %v610_v55, %v418_v61  ;;  %v636_v4 = vpop.f32.mrf.mxu1 }
 0x12a   : > { %1174 = vpow2.f32 %v1050_v3  ;;  %v612_v56 = vpop.f32.mrf.mxu0  ;;  %v428_v3 = vpop.permute.xlu0 %427 }
 0x12b   : > { %1176 = vpow2.f32 %v1057_v7  ;;  %v613_v2 = vadd.f32 %v612_v56, %v418_v61 }
 0x12c   : > { %v1163_v8 = vpop.eup %1162  ;;  %v614_v58 = vpop.f32.mrf.mxu0 }
 0x12d   : > { %v698_v11 = vadd.f32 1.0, %v1163_v8  ;;  %v615_v5 = vadd.f32 %v614_v58, %v423_v1  ;;  %v1059_v7 = vmul.f32 -1.442695, %v613_v2 }
 0x12e   : > { %v616_v60 = vpop.f32.mrf.mxu0 }
 0x12f   : > { %1178 = vrcp.f32 %v698_v11  ;;  %v617_v8 = vadd.f32 %v616_v60, %v423_v1  ;;  %v640_v11 = vpop.f32.mrf.mxu1 }
 0x130   : > { %v1165_v10 = vpop.eup %1164  ;;  %v620_v0 = vpop.f32.mrf.mxu0 }
 0x131   : > { %v700_v13 = vadd.f32 1.0, %v1165_v10  ;;  %v433_v10 = vpop.permute.xlu1 %432 }
 0x132   : > { %v1167_v12 = vpop.eup %1166  ;;  %v622_v6 = vpop.f32.mrf.mxu0 }
 0x133   : > { %v701_v18 = vadd.f32 1.0, %v1167_v12  ;;  %1180 = vrcp.f32 %v700_v13  ;;  %v1060_v12 = vmul.f32 -1.442695, %v615_v5  ;;  %v621_v13 = vadd.f32 %v620_v0, %v428_v3 }
 0x134   : > { %v1169_v14 = vpop.eup %1168 }
 0x135   : > { %v1171_v15 = vpop.eup %1170  ;;  %v702_v16 = vadd.f32 1.0, %v1169_v14  ;;  %v624_v14 = vpop.f32.mrf.mxu0 }
 0x136   : > { %v1173_v17 = vpop.eup %1172  ;;  %v699_v22 = vadd.f32 1.0, %v1171_v15  ;;  %v438_v15 = vpop.permute.xlu0 %437 }
 0x137   : > { %v1175_v19 = vpop.eup %1174  ;;  %v703_v20 = vadd.f32 1.0, %v1173_v17  ;;  %1182 = vrcp.f32 %v702_v16  ;;  %v1061_v16 = vmul.f32 -1.442695, %v617_v8  ;;  %v623_v17 = vadd.f32 %v622_v6, %v428_v3 }
 0x138   : > { %v1177_v21 = vpop.eup %1176  ;;  %v697_v24 = vadd.f32 1.0, %v1175_v19  ;;  %v1062_v19 = vmul.f32 -1.442695, %v621_v13 }
 0x139   : > { %1184 = vrcp.f32 %v703_v20  ;;  %v704_v23 = vadd.f32 1.0, %v1177_v21  ;;  %v625_v20 = vadd.f32 %v624_v14, %v433_v10  ;;  %v626_v21 = vpop.f32.mrf.mxu0 }
 0x13a   : > { %1186 = vrcp.f32 %v701_v18  ;;  %v642_v18 = vpop.f32.mrf.mxu1 }
 0x13b   : > { %1188 = vrcp.f32 %v704_v23  ;;  %v1063_v23 = vmul.f32 -1.442695, %v623_v17 }
 0x13c   : > { %1190 = vrcp.f32 %v699_v22  ;;  %v1179_v25 = vpop.eup %1178  ;;  %v443_v22 = vpop.permute.xlu1 %442 }
 0x13d   : > { %1192 = vrcp.f32 %v697_v24  ;;  %v754_v46 = vmul.f32 %v1179_v25, %v1601_v37  ;;  %v627_v24 = vadd.f32 %v626_v21, %v433_v10  ;;  %v448_v25 = vpop.permute.xlu0 %447  ;;  %v635_v55 = vadd.f32 %v634_v62, %v443_v22 }
 0x13e   : > { %v641_v5 = vadd.f32 %v640_v11, %v448_v25 }
 0x140   : > { %v1181_v26 = vpop.eup %1180 }
 0x141   : > { %v756_v41 = vmul.f32 %v1181_v26, %v1594_v32  ;;  %v644_v26 = vpop.f32.mrf.mxu1 }
 0x143   : > { %v762_v50 = vpack.c.bf16 %v756_v41, %v754_v46  ;;  %v631_v41 = vadd.f32 %v630_v57, %v438_v15 }
 0x144   : > { %v1183_v27 = vpop.eup %1182 }
 0x145   : > { %v758_v39 = vmul.f32 %v1183_v27, %v1588_v30  ;;  %v1064_v27 = vmul.f32 -1.442695, %v625_v20 }
 0x146   : > { %v1185_v29 = vpop.eup %1184 }
 0x147   : > { %v1187_v33 = vpop.eup %1186  ;;  %v759_v36 = vmul.f32 %v1185_v29, %v1585_v28  ;;  %v1065_v29 = vmul.f32 -1.442695, %v627_v24 }
 0x148   : > { %v1189_v35 = vpop.eup %1188  ;;  %v757_v43 = vmul.f32 %v1187_v33, %v1597_v34  ;;  %v453_v33 = vpop.permute.xlu1 %452 }
 0x149   : > { %v1191_v38 = vpop.eup %1190  ;;  %v760_v40 = vmul.f32 %v1189_v35, %v1591_v31  ;;  %v646_v35 = vpop.f32.mrf.mxu1  ;;  %v645_v17 = vadd.f32 %v644_v26, %v453_v33 }
 0x14a   : > { %v1193_v44 = vpop.eup %1192  ;;  %v763_v48 = vpack.c.bf16 %v759_v36, %v757_v43  ;;  %v755_v49 = vmul.f32 %v1191_v38, %v1607_v42  ;;  %v776_v38 = vpop.permute.xlu0 %775 }
 0x14b   : > { %v764_v45 = vpack.c.bf16 %v760_v40, %v758_v39  ;;  %v753_v51 = vmul.f32 %v1193_v44, %v1612_v47 }
 0x14d   : > { %822 = vmatprep.subr.bf16.mxu1 %v764_v45  ;;  %v761_v52 = vpack.c.bf16 %v755_v49, %v753_v51  ;;  %v781_v51 = vpop.permute.xlu1 %780 }
 0x14e   : > { %823 = vmatpush1.bf16.msra.mxu1 %v763_v48  ;;  %v633_v48 = vadd.f32 %v632_v59, %v438_v15  ;;  %v786_v2 = vpop.permute.xlu0 %785 }
 0x14f   : > { %824 = vmatprep.subr.bf16.mxu1 %v762_v50 }
 0x151   : > { %v791_v14 = vpop.permute.xlu1 %790 }
 0x152   : > { %825 = vmatpush1.bf16.msra.mxu1 %v761_v52 }
 0x155   : > { %1068 = vmatmul.mubr.msk.bf16.vlgmr.msra.gmra.mxu1 %vm803_vm2, %v1160_v53 }
 0x156   : > { %852 = vmatprep.mubr.bf16.mxu1 %v1338_v9  ;;  %v1058_v9 = vmul.f32 -1.442695, %v611_v63  ;;  %v637_v63 = vadd.f32 %v636_v4, %v443_v22 }
 0x158   : > { %1194 = vpow2.f32 %v1058_v9 }
 0x159   : > { %1196 = vpow2.f32 %v1059_v7 }
 0x15a   : > { %1198 = vpow2.f32 %v1060_v12  ;;  %v643_v12 = vadd.f32 %v642_v18, %v448_v25 }
 0x15b   : > { %1200 = vpow2.f32 %v1061_v16 }
 0x15c   : > { %1202 = vpow2.f32 %v1062_v19 }
 0x15d   : > { %1069 = vmatmul.mubr.msk.bf16.gmra.mxu1 %vm803_vm2, %v1161_v54  ;;  %1204 = vpow2.f32 %v1063_v23  ;;  %v647_v23 = vadd.f32 %v646_v35, %v453_v33 }
 0x15e   : > { %1206 = vpow2.f32 %v1064_v27 }
 0x15f   : > { %1208 = vpow2.f32 %v1065_v29 }
 0x165   : > { %v1195_v36 = vpop.eup %1194 }
 0x166   : > { %v1197_v40 = vpop.eup %1196  ;;  %v705_v44 = vadd.f32 1.0, %v1195_v36 }
 0x167   : > { %v1199_v46 = vpop.eup %1198  ;;  %v706_v52 = vadd.f32 1.0, %v1197_v40 }
 0x168   : > { %v1201_v54 = vpop.eup %1200  ;;  %v707_v60 = vadd.f32 1.0, %v1199_v46 }
 0x169   : > { %v1203_v57 = vpop.eup %1202  ;;  %v708_v59 = vadd.f32 1.0, %v1201_v54 }
 0x16a   : > { %v1205_v9 = vpop.eup %1204  ;;  %v709_v7 = vadd.f32 1.0, %v1203_v57 }
 0x16b   : > { %v1207_v10 = vpop.eup %1206  ;;  %v710_v15 = vadd.f32 1.0, %v1205_v9 }
 0x16c   : > { %v1209_v11 = vpop.eup %1208  ;;  %v711_v21 = vadd.f32 1.0, %v1207_v10 }
 0x16d   : > { %v712_v18 = vadd.f32 1.0, %v1209_v11 }
 0x215   : > { %v844_v39 = vpop.f32.mrf.mxu1 }
 0x216   : > { %v845_v43 = vadd.f32 %v844_v39, %v776_v38 }
 0x217   : > { %v846_v45 = vpop.f32.mrf.mxu1 }
 0x218   : > { %v863_v49 = vadd.f32 %v845_v43, %v631_v41  ;;  %v847_v50 = vadd.f32 %v846_v45, %v776_v38 }
 0x219   : > { %v848_v53 = vpop.f32.mrf.mxu1 }
 0x21a   : > { %1210 = vtanh.f32 %v863_v49  ;;  %v864_v56 = vadd.f32 %v847_v50, %v633_v48  ;;  %v849_v58 = vadd.f32 %v848_v53, %v781_v51 }
 0x21b   : > { %1212 = vrcp.f32 %v705_v44  ;;  %v850_v61 = vpop.f32.mrf.mxu1 }
 0x21c   : > { %1214 = vtanh.f32 %v864_v56  ;;  %v865_v0 = vadd.f32 %v849_v58, %v635_v55  ;;  %v851_v1 = vadd.f32 %v850_v61, %v781_v51 }
 0x21d   : > { %1216 = vrcp.f32 %v706_v52  ;;  %v854_v3 = vpop.f32.mrf.mxu1 }
 0x21e   : > { %1218 = vtanh.f32 %v865_v0  ;;  %v866_v6 = vadd.f32 %v851_v1, %v637_v63  ;;  %v855_v62 = vadd.f32 %v854_v3, %v786_v2 }
 0x21f   : > { %1220 = vrcp.f32 %v707_v60  ;;  %v856_v8 = vpop.f32.mrf.mxu1 }
 0x220   : > { %1222 = vtanh.f32 %v866_v6  ;;  %v867_v13 = vadd.f32 %v855_v62, %v641_v5  ;;  %v857_v4 = vadd.f32 %v856_v8, %v786_v2 }
 0x221   : > { %1224 = vrcp.f32 %v708_v59  ;;  %v858_v16 = vpop.f32.mrf.mxu1 }
 0x222   : > { %1226 = vtanh.f32 %v867_v13  ;;  %v868_v19 = vadd.f32 %v857_v4, %v643_v12  ;;  %v859_v20 = vadd.f32 %v858_v16, %v791_v14 }
 0x223   : > { %1228 = vrcp.f32 %v709_v7  ;;  %v860_v22 = vpop.f32.mrf.mxu1 }
 0x224   : > { %1230 = vtanh.f32 %v868_v19  ;;  %v869_v24 = vadd.f32 %v859_v20, %v645_v17  ;;  %v861_v27 = vadd.f32 %v860_v22, %v791_v14 }
 0x225   : > { %1232 = vrcp.f32 %v710_v15 }
 0x226   : > { %1234 = vtanh.f32 %v869_v24  ;;  %v870_v25 = vadd.f32 %v861_v27, %v647_v23 }
 0x227   : > { %v1211_v29 = vpop.eup %1210  ;;  %1236 = vrcp.f32 %v711_v21 }
 0x228   : > { %v1213_v36 = vpop.eup %1212  ;;  %v879_v26 = vsub.f32 %v1211_v29, %v1612_v47  ;;  %1238 = vtanh.f32 %v870_v25 }
 0x229   : > { %v1215_v38 = vpop.eup %1214  ;;  %1240 = vrcp.f32 %v712_v18 }
 0x22a   : > { %v1217_v39 = vpop.eup %1216  ;;  %v887_v40 = vmul.f32 %v1213_v36, %v879_v26  ;;  %v880_v33 = vsub.f32 %v1215_v38, %v1601_v37 }
 0x22b   : > { %v1219_v35 = vpop.eup %1218 }
 0x22c   : > { %v1221_v41 = vpop.eup %1220  ;;  %v895_v43 = vadd.f32 %v887_v40, %v1612_v47  ;;  %v888_v44 = vmul.f32 %v1217_v39, %v880_v33  ;;  %v881_v45 = vsub.f32 %v1219_v35, %v1607_v42 }
 0x22d   : > { %v1223_v46 = vpop.eup %1222 }
 0x22e   : > { %v1225_v48 = vpop.eup %1224  ;;  %903 = vst [vmem:[%s1629_s8] sm:$0xff] %v895_v43  ;;  %v896_v49 = vadd.f32 %v888_v44, %v1601_v37  ;;  %v889_v50 = vmul.f32 %v1221_v41, %v881_v45  ;;  %v882_v51 = vsub.f32 %v1223_v46, %v1594_v32 }
 0x22f   : > { %v1227_v52 = vpop.eup %1226 }
 0x230   : > { %v1229_v47 = vpop.eup %1228  ;;  %904 = vst [vmem:[%s1629_s8 + $0x8] sm:$0xff] %v896_v49  ;;  %v897_v53 = vadd.f32 %v889_v50, %v1607_v42  ;;  %v890_v54 = vmul.f32 %v1225_v48, %v882_v51  ;;  %v883_v55 = vsub.f32 %v1227_v52, %v1597_v34 }
 0x231   : > { %v1231_v56 = vpop.eup %1230 }
 0x232   : > { %v1233_v58 = vpop.eup %1232  ;;  %905 = vst [vmem:[%s1629_s8 + $0x10] sm:$0xff] %v897_v53  ;;  %v898_v37 = vadd.f32 %v890_v54, %v1594_v32  ;;  %v891_v60 = vmul.f32 %v1229_v47, %v883_v55  ;;  %v884_v61 = vsub.f32 %v1231_v56, %v1588_v30 }
 0x233   : > { %v1235_v57 = vpop.eup %1234 }
 0x234   : > { %v1237_v63 = vpop.eup %1236  ;;  %906 = vst [vmem:[%s1629_s8 + $0x18] sm:$0xff] %v898_v37  ;;  %v899_v42 = vadd.f32 %v891_v60, %v1597_v34  ;;  %v892_v0 = vmul.f32 %v1233_v58, %v884_v61  ;;  %v885_v1 = vsub.f32 %v1235_v57, %v1585_v28 }
 0x235   : > { %v1239_v2 = vpop.eup %1238 }
 0x236   : > { %907 = vst [vmem:[%s1629_s8 + $0x20] sm:$0xff] %v899_v42  ;;  %v900_v32 = vadd.f32 %v892_v0, %v1588_v30  ;;  %v893_v59 = vmul.f32 %v1237_v63, %v885_v1  ;;  %v886_v3 = vsub.f32 %v1239_v2, %v1591_v31  ;;  %v1241_v9 = vpop.eup %1240 }
 0x238   : > { %908 = vst [vmem:[%s1629_s8 + $0x28] sm:$0xff] %v900_v32  ;;  %v901_v34 = vadd.f32 %v893_v59, %v1585_v28  ;;  %v894_v5 = vmul.f32 %v1241_v9, %v886_v3 }
 0x23a   : > { %909 = vst [vmem:[%s1629_s8 + $0x30] sm:$0xff] %v901_v34  ;;  %v902_v30 = vadd.f32 %v894_v5, %v1591_v31 }
 0x23c   : > { %910 = vst [vmem:[%s1629_s8 + $0x38] sm:$0xff] %v902_v30 }
 0x23d   : > { %1281 = shalt.err (!%p1278_p7)
}
 0x23e   : > { %s1282_s16 = scalar_lea.hbm %s1653_s28, 1024  ;;  %s1286_s7 = scalar_lea.hbm %s1707_s6, 2048 }
 0x23f   : > { %p1283_p8 = scmp.ne.s32.totalorder %s1653_s28, %s1282_s16  ;;  %p1287_p0 = scmp.lt.s32.totalorder %s1653_s28, %s1707_s6 }
 0x240   : > { %p1288_p1 = scmp.lt.s32.totalorder %s1286_s7, %s1282_s16 }
 0x241   : > { %p1284_p12 = pnand %p1283_p8, %p1714_p6 }
 0x242   : > { %p1289_p2 = por %p1288_p1, %p1287_p0 }
 0x243   : > { %p1285_p13 = pneg %p1284_p12 }
 0x245   : > { %p1290_p5 = pnand %p1289_p2, %p1285_p13 }
 0x247   : > { %1293 = shalt.err (!%p1290_p5)
}
 0x248   : > { %s1340_s13 = smov 256   ;;  %s1341_s20 = smov 512  }
 0x249   : > { %s1342_s18 = smov 16  }
 0x24a   : > { %1092 = dma.vmem_to_hbm [thread:$0]  (%p1714_p6), %s1655_s12, 1024, %s1653_s28, %s912_s25, %s1340_s13, %s1341_s20, %s1342_s18  }
 0x24b PF: > { %s940_s11 = sand.u32 1, %s1320_s21   ;;  %p1715_p9 = scmp.ne.s32.totalorder %s1713_s10, 0 }
 0x24c   : > { %p1716_p10 = scmp.ge.s32.totalorder %s1332_s24, 2  ;;  %s941_s14 = scalar_lea.sflag [#allocation5], %s940_s11 }
 0x24e   : > { %p1095_p11 = pnand %p1716_p10, %p1715_p9 }
 0x250   : > { %p1096_p3 = pneg %p1095_p11 }
 0x252   : > { %1315 = dma.done.wait (%p1096_p3), %s941_s14, 1024  }
 0x253   : > { %1317 = vsyncadd (%p1096_p3), %s941_s14, 4294966272  ;;  %p19_p4 = scmp.ge.s32.totalorder %s1403_s27, 4   ;;  %s1717_s21 = smov %s1324_s22 }
 0x254   : > { %s1718_s22 = smov %s1328_s23  ;;  %s1719_s23 = smov %s1415_s30 }
 0x255   : > { %s1720_s24 = smov %s1403_s27  ;;  %21 = sbr.rel (!%p19_p4) target bundleno = 5 (0x5), region = 135 }
 0x25a   :  { %946 = vsyncpa [#allocation4], 1 }
 0x25b   :  { %948 = vsyncpa [#allocation4 + $0x1], 1 }
 0x25c   :  { %949 = vsyncpa [#allocation5], 1 }
 0x25d   :  { %951 = vsyncpa [#allocation5 + $0x1], 1 }

</bundles_post_ra>
